<compile_context>
chip_gen: v6e
topology: v6e:2x2x1
jax: 0.10.0
libtpu: 0.0.40
codegen_flags: <defaults>
</compile_context>

<pallas_src>
import functools

import jax
import jax.numpy as jnp
from jax import lax
from jax.experimental import pallas as pl
from jax.experimental.pallas import tpu as pltpu


# ------------------------------ tile planning -------------------------------

_LANE = 128                      # TPU lane width (last-dim alignment)
_TK_MAX = 4096                   # K-tile cap (DMA pipeline saturates ~1-2K)
_ROW_TM = 256                    # output row-block for the large-M path
_PATH_A_MAX_M = 1024             # single-row-block (fused) path up to this M
_VMEM_BUDGET = 24 * 1024 * 1024  # working-set budget used for tile planning
_VMEM_LIMIT = 32 * 1024 * 1024   # scoped VMEM limit handed to Mosaic


def _round_up(x, n):
    return ((x + n - 1) // n) * n


def _plan_k_tiles(k, col_bytes, resident_bytes):
    """Pick (tk, k_pad): lane-aligned K tile and K padded to a multiple of it.

    col_bytes: HBM bytes streamed per K column (all pipelined operands).
    resident_bytes: VMEM held for the whole grid (accumulator, target, ...).
    """
    budget = max(_VMEM_BUDGET - resident_bytes, 2 * col_bytes * _LANE)
    tk_cap = budget // (2 * col_bytes)            # x2: double-buffered pipeline
    tk_cap = max(_LANE, min(_TK_MAX, (tk_cap // _LANE) * _LANE))

    k128 = _round_up(k, _LANE)
    if k128 <= tk_cap:                            # single-grid-step fast path
        return k128, k128

    # Per-step pipeline overhead (~0.35us) expressed in "K columns of DMA".
    step_cols = max(_LANE, 350_000 // max(col_bytes, 1))
    best = None
    for cand in (4096, 3072, 2048, 1536, 1024, 768, 512, 384, 256, 128):
        if cand > tk_cap:
            continue
        k_pad = _round_up(k128, cand)
        cost = k_pad + (k_pad // cand) * step_cols
        if best is None or cost < best[0]:
            best = (cost, cand, k_pad)
    _, tk, k_pad = best
    return tk, k_pad


def _pad_features(f, m_pad, k_pad):
    """Zero-pad F; zero rows/cols do not change F @ F.T (Gram-safe)."""
    m, k = f.shape
    if m_pad != m or k_pad != k:
        f = jnp.pad(f, ((0, m_pad - m), (0, k_pad - k)))
    return f


# ------------------------------ Pallas kernels ------------------------------

def _partial_gram(f_blk):
    """Partial Gram of one K tile: contract last dim of F with itself (MXU)."""
    return lax.dot_general(
        f_blk, f_blk,
        dimension_numbers=(((1,), (1,)), ((), ())),
        preferred_element_type=jnp.float32,
    )


def _gram_kernel(f_ref, g_ref, *, inv_mk, single_step):
    """G = (sum_k F_k @ F_k.T) * inv_mk, single output row block."""
    part = _partial_gram(f_ref[...])
    if single_step:
        g_ref[...] = part * jnp.float32(inv_mk)
        return

    k = pl.program_id(0)

    @pl.when(k == 0)
    def _():
        g_ref[...] = jnp.zeros_like(g_ref)

    g_ref[...] += part

    @pl.when(k == pl.num_programs(0) - 1)
    def _():
        g_ref[...] = g_ref[...] * jnp.float32(inv_mk)


def _gram_mse_kernel(f_ref, t_ref, g_ref, loss_ref, *, inv_mk, inv_mm,
                     single_step):
    """Same as _gram_kernel plus fused MSE vs the target Gram (SMEM scalar)."""
    part = _partial_gram(f_ref[...])
    if single_step:
        g = part * jnp.float32(inv_mk)
        g_ref[...] = g
        diff = g - t_ref[...]
        loss_ref[0] = jnp.sum(diff * diff) * jnp.float32(inv_mm)
        return

    k = pl.program_id(0)

    @pl.when(k == 0)
    def _():
        g_ref[...] = jnp.zeros_like(g_ref)

    g_ref[...] += part

    @pl.when(k == pl.num_programs(0) - 1)
    def _():
        g = g_ref[...] * jnp.float32(inv_mk)
        g_ref[...] = g
        diff = g - t_ref[...]
        loss_ref[0] = jnp.sum(diff * diff) * jnp.float32(inv_mm)


def _gram_rows_kernel(fl_ref, fr_ref, g_ref, *, inv_mk, single_step):
    """Row-tiled Gram: one (tm, M) output row block per parallel grid index."""
    part = lax.dot_general(
        fl_ref[...], fr_ref[...],
        dimension_numbers=(((1,), (1,)), ((), ())),
        preferred_element_type=jnp.float32,
    )
    if single_step:
        g_ref[...] = part * jnp.float32(inv_mk)
        return

    k = pl.program_id(1)

    @pl.when(k == 0)
    def _():
        g_ref[...] = jnp.zeros_like(g_ref)

    g_ref[...] += part

    @pl.when(k == pl.num_programs(1) - 1)
    def _():
        g_ref[...] = g_ref[...] * jnp.float32(inv_mk)


# ------------------------------ pallas_call wrappers ------------------------

def _gram_single_rowblock(f, numel, target):
    """Path A: full-M output block, K-tiled reduction, optional fused MSE."""
    m, k = f.shape
    itemsize = jnp.dtype(f.dtype).itemsize
    fused = target is not None
    # Resident VMEM: G accumulator (2 bufs) [+ target (2 bufs)], f32.
    resident = (16 if fused else 8) * m * m
    tk, k_pad = _plan_k_tiles(k, m * itemsize, resident)
    f = _pad_features(f, m, k_pad)
    nk = k_pad // tk
    inv_mk = 1.0 / float(numel)

    f_spec = pl.BlockSpec((m, tk), lambda kk: (0, kk))     # pipelined K tiles
    g_spec = pl.BlockSpec((m, m), lambda kk: (0, 0))       # resident accumulator
    cost = pl.CostEstimate(
        flops=2 * m * m * k_pad,
        transcendentals=0,
        bytes_accessed=m * k_pad * itemsize + 4 * m * m * (2 if fused else 1),
    )
    params = pltpu.CompilerParams(
        dimension_semantics=("arbitrary",),
        vmem_limit_bytes=_VMEM_LIMIT,
    )

    if not fused:
        kernel = functools.partial(_gram_kernel, inv_mk=inv_mk,
                                   single_step=(nk == 1))
        return pl.pallas_call(
            kernel,
            out_shape=jax.ShapeDtypeStruct((m, m), jnp.float32),
            grid=(nk,),
            in_specs=[f_spec],
            out_specs=g_spec,
            compiler_params=params,
            cost_estimate=cost,
        )(f)

    kernel = functools.partial(_gram_mse_kernel, inv_mk=inv_mk,
                               inv_mm=1.0 / float(m * m),
                               single_step=(nk == 1))
    g, loss = pl.pallas_call(
        kernel,
        out_shape=(
            jax.ShapeDtypeStruct((m, m), jnp.float32),
            jax.ShapeDtypeStruct((1,), jnp.float32),
        ),
        grid=(nk,),
        in_specs=[
            f_spec,
            pl.BlockSpec((m, m), lambda kk: (0, 0)),        # target Gram
        ],
        out_specs=(
            g_spec,
            pl.BlockSpec(memory_space=pltpu.MemorySpace.SMEM),  # scalar loss
        ),
        compiler_params=params,
        cost_estimate=cost,
    )(f, target)
    return g, loss[0]


def _gram_row_tiled(f, numel):
    """Path B (large M): (tm, M) output row blocks on a parallel grid axis."""
    m, k = f.shape
    itemsize = jnp.dtype(f.dtype).itemsize
    tm = min(_ROW_TM, _round_up(m, 8))
    m_pad = _round_up(m, tm)
    n_rb = m_pad // tm

    col_bytes = (tm + m_pad) * itemsize              # LHS row block + full-M RHS
    resident = 2 * tm * m_pad * 4                    # double-buffered G block
    tk, k_pad = _plan_k_tiles(k, col_bytes, resident)
    f = _pad_features(f, m_pad, k_pad)
    nk = k_pad // tk
    inv_mk = 1.0 / float(numel)

    kernel = functools.partial(_gram_rows_kernel, inv_mk=inv_mk,
                               single_step=(nk == 1))
    cost = pl.CostEstimate(
        flops=2 * m_pad * m_pad * k_pad,
        transcendentals=0,
        bytes_accessed=(1 + n_rb) * m_pad * k_pad * itemsize + 4 * m_pad * m_pad,
    )
    g = pl.pallas_call(
        kernel,
        out_shape=jax.ShapeDtypeStruct((m_pad, m_pad), jnp.float32),
        grid=(n_rb, nk),
        in_specs=[
            pl.BlockSpec((tm, tk), lambda i, kk: (i, kk)),     # F row block (LHS)
            pl.BlockSpec((m_pad, tk), lambda i, kk: (0, kk)),  # full-M F (RHS)
        ],
        out_specs=pl.BlockSpec((tm, m_pad), lambda i, kk: (i, 0)),
        compiler_params=pltpu.CompilerParams(
            dimension_semantics=("parallel", "arbitrary"),
            vmem_limit_bytes=_VMEM_LIMIT,
        ),
        cost_estimate=cost,
    )(f, f)
    return g[:m, :m] if m_pad != m else g


def _gram(x, target=None):
    """Gram of NCHW x; if target is given also return the fused MSE loss."""
    n, c, h, w = x.shape
    m, k = n * c, h * w
    numel = n * c * h * w
    f = x.reshape(m, k)                               # native dtype, no upcast
    itemsize = jnp.dtype(f.dtype).itemsize

    fused_resident = (16 if target is not None else 8) * m * m
    fits_single_rowblock = (
        m <= _PATH_A_MAX_M
        and fused_resident + 2 * m * _LANE * itemsize <= _VMEM_BUDGET
    )
    if fits_single_rowblock:
        return _gram_single_rowblock(f, numel, target)

    g = _gram_row_tiled(f, numel)
    if target is None:
        return g
    # Large-M path: MSE epilogue on the returned Gram (one extra M^2 HBM read;
    # negligible vs the row-tiled Gram compute at this size).
    diff = g - target
    loss = jnp.sum(diff * diff) / jnp.float32(m * m)
    return g, loss


def gram_matrix(x):
    """Pallas-backed gram_matrix, identical semantics to the torch helper."""
    return _gram(x, target=None)


class StyleLossPallas:
    """Mirror of the PyTorch StyleLoss module.

    __init__ stores the (detached) target Gram; forward computes the Gram of
    the input, the MSE loss against the target (stored in self.loss), and
    returns the input unchanged.
    """

    def __init__(self, target_feature):
        self.target = gram_matrix(target_feature)     # (N*C, N*C), float32
        self.loss = None

    def forward(self, x):
        g, loss = _gram(x, target=self.target)
        self.G = g
        self.loss = loss
        return x


# --------------------------------- main -------------------------------------

def _reference(x, target_feature):
    def gram(t):
        n, c, h, w = t.shape
        f = t.reshape(n * c, h * w).astype(jnp.float32)
        g = jnp.dot(f, f.T, precision=lax.Precision.HIGHEST)
        return g / float(t.size)

    g_in = gram(x)
    g_tg = gram(target_feature)
    return g_in, jnp.mean((g_in - g_tg) ** 2)


if __name__ == "__main__":
    keys = jax.random.split(jax.random.PRNGKey(0), 8)

    def run_case(name, shape, k_t, k_x):
        tgt = jax.random.normal(k_t, shape, dtype=jnp.float32)
        x = jax.random.normal(k_x, shape, dtype=jnp.float32)
        mod = StyleLossPallas(tgt)
        out = mod.forward(x)
        jax.block_until_ready(out)
        jax.block_until_ready(mod.G)
        jax.block_until_ready(mod.loss)
        g_ref, loss_ref = _reference(x, tgt)
        assert jnp.allclose(out, x), f"{name}: forward must return input"
        assert jnp.allclose(mod.G, g_ref, rtol=5e-4, atol=1e-5), (
            f"{name}: Gram mismatch")
        assert jnp.allclose(mod.loss, loss_ref, rtol=2e-3, atol=1e-8), (
            f"{name}: loss mismatch")

    # 1) Small layer: M=8, K=256 -> single-step fused fast path.
    run_case("small", (2, 4, 16, 16), keys[0], keys[1])
    # 2) Awkward K (H*W=225 -> lane-padded to 256), still single step.
    run_case("pad_k", (1, 8, 15, 15), keys[2], keys[3])
    # 3) Long K (H*W=16384): exercises the K-tiled accumulator (4 grid steps).
    run_case("long_k", (1, 8, 128, 128), keys[4], keys[5])
    # 4) Large M (N*C=1152 > 1024): row-tiled parallel path with M padding.
    run_case("big_m", (3, 384, 8, 8), keys[6], keys[7])

    print("KERNEL_OK")
</pallas_src>

<mosaic_0001>
module attributes {stable_mosaic.version = 11 : i64} {
  func.func @_gram_kernel(%arg0: i32, %arg1: memref<8x256xf32, #tpu.memory_space<vmem>>, %arg2: memref<8x8xf32, #tpu.memory_space<vmem>>) attributes {dimension_semantics = [#tpu.dimension_semantics<arbitrary>], iteration_bounds = array<i64: 1>, scalar_prefetch = 0 : i64, scratch_operands = 0 : i64, tpu.core_type = #tpu.core_type<tc>, window_params = [{transform_indices = @transform_0, window_bounds = array<i64: 8, 256>}, {pipeline_mode = #tpu.pipeline_mode<synchronous>, transform_indices = @transform_1, window_bounds = array<i64: 8, 8>}]} {
    %c0 = arith.constant 0 : index
    %c0_0 = arith.constant 0 : index
    %0 = vector.load %arg1[%c0, %c0_0] : memref<8x256xf32, #tpu.memory_space<vmem>>, vector<8x256xf32>
    %cst = arith.constant dense<0.000000e+00> : vector<8x8xf32>
    %1 = tpu.matmul %0, %0, %cst {dimension_numbers = #tpu.dot_dimension_numbers<[1], [1], [0], [0], [0, 0, 1, 0], [], []>} : vector<8x256xf32>, vector<8x256xf32>, vector<8x8xf32> -> vector<8x8xf32>
    %cst_1 = arith.constant 4.8828125E-4 : f32
    %2 = vector.broadcast %cst_1 : f32 to vector<8x8xf32>
    %3 = arith.mulf %1, %2 : vector<8x8xf32>
    %c0_2 = arith.constant 0 : index
    %c0_3 = arith.constant 0 : index
    %4 = vector.load %arg2[%c0_2, %c0_3] : memref<8x8xf32, #tpu.memory_space<vmem>>, vector<8x8xf32>
    tpu.vector_store %arg2[%c0_2, %c0_3], %3 {strides = array<i32>} : memref<8x8xf32, #tpu.memory_space<vmem>>, vector<8x8xf32>,
    return
  }
  func.func @transform_0(%arg0: i32) -> (i32, i32) {
    %c0_i32 = arith.constant 0 : i32
    %c0_i32_0 = arith.constant 0 : i32
    return %c0_i32, %arg0 : i32, i32
  }
  func.func @transform_1(%arg0: i32) -> (i32, i32) {
    %c0_i32 = arith.constant 0 : i32
    %c0_i32_0 = arith.constant 0 : i32
    %c0_i32_1 = arith.constant 0 : i32
    return %c0_i32, %c0_i32_0 : i32, i32
  }
}

</mosaic_0001>

<bundles_post_ra>
// kernel: tpu_custom_call.1
= control target key start
LH: loop header
LB: loop body
LE: loop exit
PB: predicated region body
PF: predicated region fallthrough
CT: control target
= control target key end

     0   :  { %6 = vsyncpa [#allocation3], 0  ;;  %s175_s0 = inlined_call_operand.hbm [shape: f32[8,256], index: 0, kind: input, shape index: {}]   ;;  %s176_s1 = inlined_call_operand.hbm [shape: f32[8,8], index: 1, kind: output, shape index: {}]  }
   0x1   :  { %7 = vsyncpa [#allocation4], 0  ;;  %s157_s6 = smov [#allocation2]  }
   0x2   :  { %s14_s7 = sshll.u32 %s157_s6, 4  ;;  %s15_s7 = int_to_ptr.vmem [resolvable:$true] %s14_s7 }
   0x3   :  { %s121_s8 = scalar_lea.vmem %s15_s7, 256  ;;  %p126_p1 = scmp.lt.s32.totalorder %s15_s7, %s15_s7 }
   0x4   :  { %p122_p0 = scmp.ne.s32.totalorder %s15_s7, %s121_s8  ;;  %p127_p2 = scmp.lt.s32.totalorder %s121_s8, %s121_s8 }
   0x6   :  { %p128_p3 = por %p127_p2, %p126_p1 }
   0x8   :  { %p129_p4 = pnand %p128_p3, %p122_p0 }
   0xa   :  { %132 = shalt.err (!%p129_p4)
}
   0xb   :  { %17 = dma.hbm_to_vmem [thread:$0]  %s175_s0, 256, %s15_s7, [#allocation3]  }
   0xc   :  { %153 = dma.done.wait [#allocation3], 256  }
   0xd   :  { %154 = vsyncadd [#allocation3], 4294967040  ;;  %v22_v0 = vld [vmem:[#allocation2 + $0x8] sm:$0xff]  ;;  %v21_v1 = vld [vmem:[#allocation2] sm:$0xff]  ;;  %s158_s11 = smov [#allocation5]   ;;  %vm94_vm0 = vcmask 64512  }
   0xe   :  { %53 = vmatprep.subr.mxu0 %v22_v0  ;;  %87 = vmatprep.mubr.f32.mxu0 %v22_v0  ;;  %s102_s12 = sshll.u32 %s158_s11, 4  ;;  %s103_s12 = int_to_ptr.vmem [resolvable:$true] %s102_s12 }
   0xf   :  { %54 = vmatpush1.xpose.msra.mxu0 %v21_v1  ;;  %s133_s13 = scalar_lea.vmem %s103_s12, 128  ;;  %p138_p6 = scmp.lt.s32.totalorder %s103_s12, %s103_s12 }
  0x10   :  { %p134_p5 = scmp.ne.s32.totalorder %s103_s12, %s133_s13  ;;  %p139_p7 = scmp.lt.s32.totalorder %s133_s13, %s133_s13 }
  0x12   :  { %88 = vmatmul.mubr.f32.vlgmr.msra.gmra.mxu0 %v21_v1  ;;  %p140_p8 = por %p139_p7, %p138_p6 }
  0x14   :  { %p141_p9 = pnand %p140_p8, %p134_p5 }
  0xd2   :  { %v89_v2 = vpop.f32.mrf.mxu0 }
  0xd3   :  { %v93_v3 = vmul.f32 0.00048828125, %v89_v2 }
  0xd4   :  { %v91_v4 = vpop.f32.mrf.mxu0 }
  0xd5   :  { %95 = vst.msk [vmem:[#allocation5] sm:$0xff] %vm94_vm0, %v93_v3 }
  0xd6   :  { %144 = shalt.err (!%p141_p9)
}
  0xd7   :  { %105 = dma.vmem_to_hbm [thread:$0]  %s103_s12, 128, %s176_s1, [#allocation4]  }
  0xd8   :  { %155 = dma.done.wait [#allocation4], 128  }
  0xd9   :  { %156 = vsyncadd [#allocation4], 4294967168 }
  0xda   :  { %109 = vsyncpa [#allocation3], 1 }
  0xdb   :  { %110 = vsyncpa [#allocation4], 1 }

</bundles_post_ra>
